<compile_context>
chip_gen: v7x
topology: tpu7x:2x2x1
jax: 0.10.0
libtpu: 0.0.40
codegen_flags: <defaults>
</compile_context>

<pallas_src>
import math

import jax
import jax.numpy as jnp
import numpy as np
from jax.experimental import pallas as pl
from jax.experimental.pallas import tpu as pltpu

_MASK_FILL = float(np.finfo(np.float32).min)   # torch.finfo(dtype).min


# ---------------------------------------------------------------------------
# Linear: y = x @ W^T + b   (PyTorch nn.Linear convention)
# ---------------------------------------------------------------------------
def _linear_kernel(x_ref, wt_ref, b_ref, o_ref):
    # x_ref: (tm, Din)   wt_ref: (Din, Dout)   b_ref: (1, Dout)   o_ref: (tm, Dout)
    y = jnp.dot(x_ref[...], wt_ref[...], preferred_element_type=jnp.float32)
    o_ref[...] = (y + b_ref[...]).astype(o_ref.dtype)


def linear_pallas(x, w, b):
    """x: [N, Din]; w: [Dout, Din] (PyTorch layout); b: [Dout] -> [N, Dout]."""
    n, d_in = x.shape
    d_out = w.shape[0]
    wt = w.T                       # layout plumbing outside the kernel
    b2 = b.reshape(1, d_out)

    tm = n if n <= 256 else 256    # row tile (full extent for small N)
    assert n % tm == 0, "row count must tile evenly (pad upstream if needed)"

    grid_spec = pltpu.PrefetchScalarGridSpec(
        num_scalar_prefetch=0,
        grid=(n // tm,),
        in_specs=[
            pl.BlockSpec((tm, d_in), lambda i: (i, 0)),
            pl.BlockSpec((d_in, d_out), lambda i: (0, 0)),   # weight resident in VMEM
            pl.BlockSpec((1, d_out), lambda i: (0, 0)),      # bias resident in VMEM
        ],
        out_specs=pl.BlockSpec((tm, d_out), lambda i: (i, 0)),
    )
    return pl.pallas_call(
        _linear_kernel,
        out_shape=jax.ShapeDtypeStruct((n, d_out), x.dtype),
        grid_spec=grid_spec,
        compiler_params=pltpu.CompilerParams(dimension_semantics=("parallel",)),
    )(x, wt, b2)


# ---------------------------------------------------------------------------
# Scaled dot-product attention, one (batch, head) tile per grid step
# ---------------------------------------------------------------------------
def _make_attn_kernel(dk):
    inv_sqrt_dk = 1.0 / math.sqrt(dk)   # Python float -> compile-time literal (no capture error)

    def attn_kernel(q_ref, k_ref, v_ref, m_ref, o_ref):
        q = q_ref[...]                  # [S, dk]
        k = k_ref[...]                  # [S, dk]
        v = v_ref[...]                  # [S, dk]
        m = m_ref[...]                  # [S, S] int32 (0 = masked)
        # scores = Q @ K^T / sqrt(dk): contract last dim of both operands on the MXU.
        s = jax.lax.dot_general(q, k, (((1,), (1,)), ((), ())),
                                preferred_element_type=jnp.float32) * inv_sqrt_dk
        s = jnp.where(m == 0, _MASK_FILL, s)
        # numerically stable softmax over the key axis
        s = s - jnp.max(s, axis=-1, keepdims=True)
        e = jnp.exp(s)
        p = e / jnp.sum(e, axis=-1, keepdims=True)
        # TODO(synk): dropout on `p` omitted (inference-mode identity).
        o_ref[...] = jnp.dot(p, v, preferred_element_type=jnp.float32).astype(o_ref.dtype)

    return attn_kernel


def attention_pallas(q, k, v, mask):
    """q/k/v: [B, H, S, dk]; mask: [B, 1, S, S] -> context [B, H, S, dk]."""
    B, H, S, dk = q.shape
    qkv_spec = pl.BlockSpec((None, None, S, dk), lambda b, h: (b, h, 0, 0))
    mask_spec = pl.BlockSpec((None, None, S, S), lambda b, h: (b, 0, 0, 0))

    grid_spec = pltpu.PrefetchScalarGridSpec(
        num_scalar_prefetch=0,
        grid=(B, H),
        in_specs=[qkv_spec, qkv_spec, qkv_spec, mask_spec],
        out_specs=pl.BlockSpec((None, None, S, dk), lambda b, h: (b, h, 0, 0)),
    )
    return pl.pallas_call(
        _make_attn_kernel(dk),
        out_shape=jax.ShapeDtypeStruct((B, H, S, dk), q.dtype),
        grid_spec=grid_spec,
        compiler_params=pltpu.CompilerParams(
            dimension_semantics=("parallel", "parallel")),
    )(q, k, v, mask)


# ---------------------------------------------------------------------------
# Full MultiHeadAttentionBlock forward
# ---------------------------------------------------------------------------
def multi_head_attention_forward(q, k, v, mask, params, num_heads):
    B, S, D = q.shape
    assert D % num_heads == 0, "dModel is not divisible by numheads"
    dk = D // num_heads

    def project(x, w, b):
        return linear_pallas(x.reshape(B * S, D), w, b).reshape(B, S, D)

    query = project(q, params["wq"], params["bq"])
    key   = project(k, params["wk"], params["bk"])
    value = project(v, params["wv"], params["bv"])

    def split_heads(x):   # [B,S,D] -> [B,H,S,dk]  (== .view(...).transpose(1,2))
        return x.reshape(B, S, num_heads, dk).transpose(0, 2, 1, 3)

    ctx = attention_pallas(split_heads(query), split_heads(key),
                           split_heads(value), mask)          # [B,H,S,dk]
    ctx = ctx.transpose(0, 2, 1, 3).reshape(B * S, D)          # merge heads
    out = linear_pallas(ctx, params["wo"], params["bo"])
    return out.reshape(B, S, D)


# ---------------------------------------------------------------------------
# Pure-JAX reference (for correctness check)
# ---------------------------------------------------------------------------
def _reference_mha(q, k, v, mask, params, num_heads):
    B, S, D = q.shape
    dk = D // num_heads
    lin = lambda x, w, b: x @ w.T + b
    split = lambda x: x.reshape(B, S, num_heads, dk).transpose(0, 2, 1, 3)
    Q = split(lin(q, params["wq"], params["bq"]))
    K = split(lin(k, params["wk"], params["bk"]))
    V = split(lin(v, params["wv"], params["bv"]))
    s = jnp.einsum("bhqd,bhkd->bhqk", Q, K) / math.sqrt(dk)
    s = jnp.where(mask == 0, _MASK_FILL, s)
    p = jax.nn.softmax(s, axis=-1)
    ctx = jnp.einsum("bhqk,bhkd->bhqd", p, V)
    ctx = ctx.transpose(0, 2, 1, 3).reshape(B, S, D)
    return lin(ctx, params["wo"], params["bo"])


if __name__ == "__main__":
    B, S, d_model, num_heads = 2, 8, 128, 4     # dk = 32

    key = jax.random.PRNGKey(0)
    ks = jax.random.split(key, 12)
    bound = 1.0 / math.sqrt(d_model)            # nn.Linear default init range

    def init_linear(kw, kb):
        w = jax.random.uniform(kw, (d_model, d_model), jnp.float32, -bound, bound)
        b = jax.random.uniform(kb, (d_model,), jnp.float32, -bound, bound)
        return w, b

    wq, bq = init_linear(ks[0], ks[1])
    wk, bk = init_linear(ks[2], ks[3])
    wv, bv = init_linear(ks[4], ks[5])
    wo, bo = init_linear(ks[6], ks[7])
    params = dict(wq=wq, bq=bq, wk=wk, bk=bk, wv=wv, bv=bv, wo=wo, bo=bo)

    q = jax.random.normal(ks[8], (B, S, d_model), jnp.float32)
    k = jax.random.normal(ks[9], (B, S, d_model), jnp.float32)
    v = jax.random.normal(ks[10], (B, S, d_model), jnp.float32)
    # causal mask, 0 = masked, broadcast over heads (shape [B, 1, S, S])
    mask = jnp.tile(jnp.tril(jnp.ones((S, S), jnp.int32))[None, None], (B, 1, 1, 1))

    out = multi_head_attention_forward(q, k, v, mask, params, num_heads)
    out = jax.block_until_ready(out)

    ref = _reference_mha(q, k, v, mask, params, num_heads)
    # Loose-ish tolerance: Pallas MXU and the XLA reference may use different
    # default matmul pass counts for f32; structural errors would be O(1).
    np.testing.assert_allclose(np.asarray(out), np.asarray(ref), rtol=5e-2, atol=5e-2)

    print("KERNEL_OK")
</pallas_src>

<mosaic_0001>
module attributes {stable_mosaic.version = 11 : i64} {
  func.func @_linear_kernel(%arg0: i32, %arg1: memref<16x128xf32, #tpu.memory_space<vmem>>, %arg2: memref<128x128xf32, #tpu.memory_space<vmem>>, %arg3: memref<1x128xf32, #tpu.memory_space<vmem>>, %arg4: memref<16x128xf32, #tpu.memory_space<vmem>>) attributes {dimension_semantics = [#tpu.dimension_semantics<parallel>], iteration_bounds = array<i64: 1>, scalar_prefetch = 0 : i64, scratch_operands = 0 : i64, tpu.core_type = #tpu.core_type<tc>, window_params = [{transform_indices = @transform_0, window_bounds = array<i64: 16, 128>}, {pipeline_mode = #tpu.pipeline_mode<synchronous>, transform_indices = @transform_1, window_bounds = array<i64: 128, 128>}, {pipeline_mode = #tpu.pipeline_mode<synchronous>, transform_indices = @transform_2, window_bounds = array<i64: 1, 128>}, {transform_indices = @transform_3, window_bounds = array<i64: 16, 128>}]} {
    %c0 = arith.constant 0 : index
    %c0_0 = arith.constant 0 : index
    %0 = vector.load %arg1[%c0, %c0_0] : memref<16x128xf32, #tpu.memory_space<vmem>>, vector<16x128xf32>
    %c0_1 = arith.constant 0 : index
    %c0_2 = arith.constant 0 : index
    %1 = vector.load %arg2[%c0_1, %c0_2] : memref<128x128xf32, #tpu.memory_space<vmem>>, vector<128x128xf32>
    %cst = arith.constant dense<0.000000e+00> : vector<16x128xf32>
    %2 = tpu.matmul %0, %1, %cst {dimension_numbers = #tpu.dot_dimension_numbers<[1], [0], [0], [1], [0, 0, 1, 1], [], []>} : vector<16x128xf32>, vector<128x128xf32>, vector<16x128xf32> -> vector<16x128xf32>
    %c0_3 = arith.constant 0 : index
    %c0_4 = arith.constant 0 : index
    %3 = vector.load %arg3[%c0_3, %c0_4] : memref<1x128xf32, #tpu.memory_space<vmem>>, vector<1x128xf32>
    %4 = vector.broadcast %3 : vector<1x128xf32> to vector<16x128xf32>
    %5 = arith.addf %2, %4 : vector<16x128xf32>
    %c0_5 = arith.constant 0 : index
    %c0_6 = arith.constant 0 : index
    %6 = vector.load %arg4[%c0_5, %c0_6] : memref<16x128xf32, #tpu.memory_space<vmem>>, vector<16x128xf32>
    tpu.vector_store %arg4[%c0_5, %c0_6], %5 {strides = array<i32>} : memref<16x128xf32, #tpu.memory_space<vmem>>, vector<16x128xf32>,
    return
  }
  func.func @transform_0(%arg0: i32) -> (i32, i32) {
    %c0_i32 = arith.constant 0 : i32
    %c0_i32_0 = arith.constant 0 : i32
    return %arg0, %c0_i32 : i32, i32
  }
  func.func @transform_1(%arg0: i32) -> (i32, i32) {
    %c0_i32 = arith.constant 0 : i32
    %c0_i32_0 = arith.constant 0 : i32
    %c0_i32_1 = arith.constant 0 : i32
    return %c0_i32, %c0_i32_0 : i32, i32
  }
  func.func @transform_2(%arg0: i32) -> (i32, i32) {
    %c0_i32 = arith.constant 0 : i32
    %c0_i32_0 = arith.constant 0 : i32
    %c0_i32_1 = arith.constant 0 : i32
    return %c0_i32, %c0_i32_0 : i32, i32
  }
  func.func @transform_3(%arg0: i32) -> (i32, i32) {
    %c0_i32 = arith.constant 0 : i32
    %c0_i32_0 = arith.constant 0 : i32
    return %arg0, %c0_i32 : i32, i32
  }
}

</mosaic_0001>

<bundles_post_ra>
// kernel: tpu_custom_call.1
= control target key start
LH: loop header
LB: loop body
LE: loop exit
PB: predicated region body
PF: predicated region fallthrough
CT: control target
= control target key end

     0   :  { %8 = vsyncpa [#allocation3], 0  ;;  %s399_s0 = inlined_call_operand.hbm [shape: f32[16,128], index: 0, kind: input, shape index: {}]   ;;  %s400_s1 = inlined_call_operand.hbm [shape: f32[128,128], index: 1, kind: input, shape index: {}]   ;;  %s401_s2 = inlined_call_operand.vmem [shape: f32[1,128], index: 2, kind: input, shape index: {}]   ;;  %s402_s3 = inlined_call_operand.hbm [shape: f32[16,128], index: 3, kind: output, shape index: {}]  }
   0x1   :  { %9 = vsyncpa [#allocation6], 0 }
   0x2   :  { %10 = vsyncpa [#allocation4], 0  ;;  %s326_s12 = smov [#allocation2]   ;;  %s254_s16 = scalar_lea.hbm %s399_s0, 256 }
   0x3   :  { %s16_s13 = sshll.u32 %s326_s12, 4  ;;  %p255_p0 = scmp.ne.s32.totalorder %s399_s0, %s254_s16  ;;  %s17_s13 = int_to_ptr.vmem [resolvable:$true] %s16_s13 }
   0x4   :  { %p258_p1 = scmp.lt.u32.totalorder %s254_s16, %s399_s0 }
   0x6   :  { %p260_p2 = pnand %p258_p1, %p255_p0 }
   0x8   :  { %263 = shalt.err (!%p260_p2)
}
   0x9   :  { %s264_s21 = scalar_lea.vmem %s17_s13, 256  ;;  %p269_p4 = scmp.lt.s32.totalorder %s17_s13, %s17_s13 }
   0xa   :  { %p265_p3 = scmp.ne.s32.totalorder %s17_s13, %s264_s21  ;;  %p270_p5 = scmp.lt.s32.totalorder %s264_s21, %s264_s21 }
   0xc   :  { %p271_p6 = por %p270_p5, %p269_p4 }
   0xe   :  { %p272_p7 = pnand %p271_p6, %p265_p3 }
  0x10   :  { %275 = shalt.err (!%p272_p7)
}
  0x11   :  { %s327_s22 = smov 128   ;;  %s328_s23 = smov 8  }
  0x12   :  { %22 = dma.hbm_to_vmem [thread:$0]  %s399_s0, 256, %s17_s13, [#allocation3], %s327_s22, %s327_s22, %s328_s23  }
  0x13   :  { %s329_s26 = smov [#allocation5]   ;;  %s276_s30 = scalar_lea.hbm %s400_s1, 2048 }
  0x14   :  { %s28_s27 = sshll.u32 %s329_s26, 4  ;;  %p277_p8 = scmp.ne.s32.totalorder %s400_s1, %s276_s30  ;;  %s29_s27 = int_to_ptr.vmem [resolvable:$true] %s28_s27 }
  0x15   :  { %p280_p9 = scmp.lt.u32.totalorder %s276_s30, %s400_s1 }
  0x17   :  { %p282_p10 = pnand %p280_p9, %p277_p8 }
  0x19   :  { %285 = shalt.err (!%p282_p10)
}
  0x1a   :  { %s286_s8 = scalar_lea.vmem %s29_s27, 2048  ;;  %p291_p12 = scmp.lt.s32.totalorder %s29_s27, %s29_s27 }
  0x1b   :  { %p287_p11 = scmp.ne.s32.totalorder %s29_s27, %s286_s8  ;;  %p292_p13 = scmp.lt.s32.totalorder %s286_s8, %s286_s8 }
  0x1d   :  { %p293_p0 = por %p292_p13, %p291_p12 }
  0x1f   :  { %p294_p1 = pnand %p293_p0, %p287_p11 }
  0x21   :  { %297 = shalt.err (!%p294_p1)
}
  0x22   :  { %34 = dma.hbm_to_vmem [thread:$0]  %s400_s1, 2048, %s29_s27, [#allocation6], %s327_s22, %s327_s22, %s328_s23  }
  0x23   :  { %320 = dma.done.wait [#allocation3], 256  }
  0x24   :  { %321 = vsyncadd [#allocation3], 4294967040 }
  0x25   :  { %322 = dma.done.wait [#allocation6], 2048  }
  0x26   :  { %323 = vsyncadd [#allocation6], 4294965248  ;;  %v45_v0 = vld [vmem:[#allocation5] sm:$0xff]  ;;  %v46_v1 = vld [vmem:[#allocation5 + $0x8] sm:$0xff]  ;;  %s330_s11 = smov [#allocation7]  }
  0x27   :  { %v47_v2 = vld [vmem:[#allocation5 + $0x10] sm:$0xff]  ;;  %v217_v3 = vpack.c.bf16 %v46_v1, %v45_v0  ;;  %v48_v4 = vld [vmem:[#allocation5 + $0x18] sm:$0xff]  ;;  %v49_v6 = vld [vmem:[#allocation5 + $0x20] sm:$0xff]  ;;  %s150_s12 = sshll.u32 %s330_s11, 4  ;;  %s151_s12 = int_to_ptr.vmem [resolvable:$true] %s150_s12 }
  0x28   :  { %v221_v5 = vpack.c.bf16 %v48_v4, %v47_v2  ;;  %v50_v7 = vld [vmem:[#allocation5 + $0x28] sm:$0xff]  ;;  %v43_v9 = vld [vmem:[#allocation2] sm:$0xff]  ;;  %v52_v11 = vld [vmem:[#allocation5 + $0x38] sm:$0xff]  ;;  %s298_s13 = scalar_lea.vmem %s151_s12, 256  ;;  %p303_p3 = scmp.lt.s32.totalorder %s151_s12, %s151_s12 }
  0x29   :  { %218 = vmatprep.subr.bf16.mxu0 %v217_v3  ;;  %v225_v8 = vpack.c.bf16 %v50_v7, %v49_v6  ;;  %v51_v10 = vld [vmem:[#allocation5 + $0x30] sm:$0xff]  ;;  %214 = vmatprep.mubr.f32.mxu0 %v43_v9  ;;  %v53_v13 = vld [vmem:[#allocation5 + $0x40] sm:$0xff]  ;;  %v54_v14 = vld [vmem:[#allocation5 + $0x48] sm:$0xff]  ;;  %p299_p2 = scmp.ne.s32.totalorder %s151_s12, %s298_s13  ;;  %p304_p4 = scmp.lt.s32.totalorder %s298_s13, %s298_s13 }
  0x2a   :  { %220 = vmatpush3.bf16.msra.mxu0 %v217_v3  ;;  %v229_v12 = vpack.c.bf16 %v52_v11, %v51_v10  ;;  %v233_v15 = vpack.c.bf16 %v54_v14, %v53_v13  ;;  %v55_v16 = vld [vmem:[#allocation5 + $0x50] sm:$0xff]  ;;  %v56_v17 = vld [vmem:[#allocation5 + $0x58] sm:$0xff]  ;;  %v57_v19 = vld [vmem:[#allocation5 + $0x60] sm:$0xff] }
  0x2b   :  { %222 = vmatprep.subr.bf16.mxu0 %v221_v5  ;;  %v237_v18 = vpack.c.bf16 %v56_v17, %v55_v16  ;;  %v58_v20 = vld [vmem:[#allocation5 + $0x68] sm:$0xff]  ;;  %v59_v22 = vld [vmem:[#allocation5 + $0x70] sm:$0xff]  ;;  %v60_v23 = vld [vmem:[#allocation5 + $0x78] sm:$0xff]  ;;  %p305_p5 = por %p304_p4, %p303_p3 }
  0x2c   :  { %v241_v21 = vpack.c.bf16 %v58_v20, %v57_v19  ;;  %v245_v24 = vpack.c.bf16 %v60_v23, %v59_v22  ;;  %v44_v25 = vld [vmem:[#allocation2 + $0x8] sm:$0xff]  ;;  %v163_v26 = vld [vmem:[%s401_s2] ss:$0 sm:$0xff] }
  0x2d   :  { %p306_p6 = pnand %p305_p5, %p299_p2 }
  0x2e   :  { %224 = vmatpush3.bf16.msra.mxu0 %v221_v5 }
  0x2f   :  { %226 = vmatprep.subr.bf16.mxu0 %v225_v8 }
  0x32   :  { %228 = vmatpush3.bf16.msra.mxu0 %v225_v8 }
  0x33   :  { %230 = vmatprep.subr.bf16.mxu0 %v229_v12 }
  0x36   :  { %232 = vmatpush3.bf16.msra.mxu0 %v229_v12 }
  0x37   :  { %234 = vmatprep.subr.bf16.mxu0 %v233_v15 }
  0x3a   :  { %236 = vmatpush3.bf16.msra.mxu0 %v233_v15 }
  0x3b   :  { %238 = vmatprep.subr.bf16.mxu0 %v237_v18 }
  0x3e   :  { %240 = vmatpush3.bf16.msra.mxu0 %v237_v18 }
  0x3f   :  { %242 = vmatprep.subr.bf16.mxu0 %v241_v21 }
  0x42   :  { %244 = vmatpush3.bf16.msra.mxu0 %v241_v21 }
  0x43   :  { %246 = vmatprep.subr.bf16.mxu0 %v245_v24 }
  0x46   :  { %248 = vmatpush3.bf16.msra.mxu0 %v245_v24 }
  0x49   :  { %215 = vmatmul.mubr.f32.vlgmr.msra.gmra.mrb[0].mxu0 %v44_v25 }
 0x11c   :  { %v216_v27 = vpop.f32.mrb[0].mxu0 }
 0x11d   :  { %v140_v28 = vadd.f32 %v216_v27, %v163_v26  ;;  %v134_v29 = vpop.f32.mrb[1].mxu0 }
 0x11e   :  { %v135_v30 = vadd.f32 %v163_v26, %v134_v29 }
 0x11f   :  { %144 = vst [vmem:[#allocation7 + $0x8] sm:$0xff] %v140_v28 }
 0x120   :  { %143 = vst [vmem:[#allocation7] sm:$0xff] %v135_v30 }
 0x121   :  { %309 = shalt.err (!%p306_p6)
}
 0x122   :  { %s310_s2 = scalar_lea.hbm %s402_s3, 256 }
 0x123   :  { %p311_p7 = scmp.ne.s32.totalorder %s402_s3, %s310_s2  ;;  %p314_p8 = scmp.lt.u32.totalorder %s310_s2, %s402_s3 }
 0x125   :  { %p316_p9 = pnand %p314_p8, %p311_p7 }
 0x127   :  { %319 = shalt.err (!%p316_p9)
}
 0x128   :  { %156 = dma.vmem_to_hbm [thread:$0]  %s151_s12, 256, %s402_s3, [#allocation4], %s327_s22, %s327_s22, %s328_s23  }
 0x129   :  { %324 = dma.done.wait [#allocation4], 256  }
 0x12a   :  { %325 = vsyncadd [#allocation4], 4294967040 }
 0x12b   :  { %160 = vsyncpa [#allocation3], 1 }
 0x12c   :  { %161 = vsyncpa [#allocation6], 1 }
 0x12d   :  { %162 = vsyncpa [#allocation4], 1 }

</bundles_post_ra>
